<compile_context>
chip_gen: v6e
topology: v6e:2x2x1
jax: 0.10.0
libtpu: 0.0.40
codegen_flags: <defaults>
</compile_context>

<pallas_src>
import functools

import jax
import jax.numpy as jnp
from jax import lax
from jax.experimental import pallas as pl
from jax.experimental.pallas import tpu as pltpu


def _round_up(a: int, b: int) -> int:
    return (a + b - 1) // b * b


def _pick_row_tile(n: int, target: int) -> int:
    """Row tile: multiple of 8, <= round_up(n, 8), and small enough that there
    are >= 2 tiles (so the batch axis can shard across TensorCores on v7x)."""
    t = min(target, _round_up(n, 8))
    if n > 8:
        t = min(t, _round_up((n + 1) // 2, 8))
    return max(8, _round_up(t, 8))


# ----------------------------------------------------------------------------
# Phase 1: a = relu(x @ W1 + b1) @ W2 + b2, plus per-tile BN partial stats.
# Grid: (N tiles, V reduction tiles); semantics ("parallel", "arbitrary").
# ----------------------------------------------------------------------------
def _phase1_kernel(x_ref, w1_ref, b1_ref, w2_ref, b2_ref,
                   a_ref, stats_ref, h_acc,
                   *, n_rows, v_cols, tk, w1_resident, mask_k):
    i = pl.program_id(0)
    k = pl.program_id(1)

    @pl.when(k == 0)
    def _():
        h_acc[...] = jnp.zeros_like(h_acc)

    # x stays f32 (and unpadded) in HBM; cast per tile for the MXU.
    x_t = x_ref[...].astype(w1_ref.dtype)
    if mask_k:
        # The last K tile reads past V: zero the out-of-range columns (OOB
        # reads are undefined and would otherwise poison the accumulation).
        col = lax.broadcasted_iota(jnp.int32, x_t.shape, 1) + k * tk
        x_t = jnp.where(col < v_cols, x_t, jnp.zeros_like(x_t))

    if w1_resident:
        # W1 lives in VMEM for the whole call; slice the current K chunk.
        w1_t = w1_ref[pl.ds(pl.multiple_of(k * tk, tk), tk), :]
    else:
        w1_t = w1_ref[...]

    h_acc[...] += jnp.dot(x_t, w1_t, preferred_element_type=jnp.float32)

    @pl.when(k == pl.num_programs(1) - 1)
    def _():
        h = jnp.maximum(h_acc[...] + b1_ref[...], 0.0)          # ReLU (f32)
        # TODO(synk): nn.Dropout treated as identity (eval-mode semantics);
        # training parity would need pltpu.prng_seed/prng_random_bits masking.
        a = jnp.dot(h.astype(w2_ref.dtype), w2_ref[...],
                    preferred_element_type=jnp.float32) + b2_ref[...]
        a_ref[...] = a

        # Per-tile BatchNorm partial stats (sum, sum of squares); rows past
        # the true batch size are masked with a select (OOB rows may be NaN).
        tm, tp = a.shape
        row = lax.broadcasted_iota(jnp.int32, (tm, tp), 0) + i * tm
        a_m = jnp.where(row < n_rows, a, 0.0)
        s = jnp.sum(a_m, axis=0, keepdims=True)                  # (1, tp)
        sq = jnp.sum(a_m * a_m, axis=0, keepdims=True)           # (1, tp)
        r8 = lax.broadcasted_iota(jnp.int32, (8, tp), 0)
        stats_ref[0] = jnp.where(r8 == 0, s, jnp.where(r8 == 1, sq, 0.0))


# ----------------------------------------------------------------------------
# Phase 2: BatchNorm1d (training-mode batch stats) + softplus + clamp.
# Grid: (N tiles,) with "parallel" semantics; stats block is constant-index.
# ----------------------------------------------------------------------------
def _bn_softplus_kernel(stats_ref, a_ref, gamma_ref, beta_ref, o_ref,
                        *, n_rows, eps):
    st = jnp.sum(stats_ref[...], axis=0)                 # (8, t_pad): tiny
    inv_n = jnp.float32(1.0 / n_rows)
    mean = st[0:1, :] * inv_n                            # (1, t_pad)
    var = jnp.maximum(st[1:2, :] * inv_n - mean * mean, 0.0)   # biased var
    scale = lax.rsqrt(var + jnp.float32(eps)) * gamma_ref[...]  # gamma == 1
    z = (a_ref[...] - mean) * scale + beta_ref[...]
    sp = jnp.maximum(z, 0.0) + jnp.log1p(jnp.exp(-jnp.abs(z)))  # softplus
    o_ref[...] = jnp.maximum(sp, jnp.float32(1e-5))


# ----------------------------------------------------------------------------
# Wrapper
# ----------------------------------------------------------------------------
def encoder_forward(x, w1, b1, w2, b2, gamma, beta, *,
                    tm=None, tk=None, mxu_dtype=jnp.bfloat16, w1_resident=None):
    """x:(N,V) float; w1:(V,E); b1:(1,E); w2:(E,T); b2,gamma,beta:(1,T)."""
    n, v = x.shape
    e = w1.shape[1]
    t = w2.shape[1]

    try:
        vmem_cap = pltpu.get_tpu_info().vmem_capacity_bytes
    except Exception:  # pragma: no cover - conservative fallback (v7x size)
        vmem_cap = 64 << 20

    lane = 128
    e_pad = _round_up(e, lane)
    t_pad = _round_up(t, lane)

    # Large tiles (kernel is HBM-bandwidth bound), >=2 N tiles for megacore,
    # shrunk if the footprint would exceed ~70% of this generation's VMEM.
    if tm is None:
        tm = _pick_row_tile(n, 1024)
    else:
        tm = max(8, min(_round_up(tm, 8), _round_up(n, 8)))
    if tk is None:
        tk = 2048
    tk = max(lane, min(_round_up(tk, lane), _round_up(v, lane)))

    itemsize_x = jnp.dtype(x.dtype).itemsize
    itemsize_w = jnp.dtype(mxu_dtype).itemsize

    def footprint(tm_, tk_, resident_):
        v_pad_ = _round_up(v, tk_)
        fp = 2 * tm_ * tk_ * itemsize_x                               # x
        fp += 2 * (v_pad_ if resident_ else tk_) * e_pad * itemsize_w  # W1
        fp += 2 * e_pad * t_pad * itemsize_w                          # W2
        fp += 4 * (e_pad + 2 * t_pad) * 4                             # biases
        fp += tm_ * e_pad * 4                                         # h acc
        fp += 2 * tm_ * t_pad * 4                                     # a out
        fp += 2 * 8 * t_pad * 4                                       # stats
        return fp

    budget = int(vmem_cap * 0.70)
    if w1_resident is None:
        w1_resident = 2 * _round_up(v, tk) * e_pad * itemsize_w <= vmem_cap // 6
    while footprint(tm, tk, w1_resident) > budget and tk > lane:
        tk = max(lane, _round_up(tk // 2, lane))
    while footprint(tm, tk, w1_resident) > budget and tm > 8:
        tm = max(8, _round_up(tm // 2, 8))
    if w1_resident and footprint(tm, tk, w1_resident) > budget:
        w1_resident = False

    v_pad = _round_up(v, tk)
    mask_k = (v % tk) != 0

    # Only the small operands get padded/cast copies; x is passed as-is.
    w1p = jnp.zeros((v_pad, e_pad), mxu_dtype).at[:v, :e].set(w1.astype(mxu_dtype))
    w2p = jnp.zeros((e_pad, t_pad), mxu_dtype).at[:e, :t].set(w2.astype(mxu_dtype))
    b1p = jnp.zeros((1, e_pad), jnp.float32).at[:, :e].set(b1.astype(jnp.float32))
    b2p = jnp.zeros((1, t_pad), jnp.float32).at[:, :t].set(b2.astype(jnp.float32))
    gp = jnp.ones((1, t_pad), jnp.float32).at[:, :t].set(gamma.astype(jnp.float32))
    bp = jnp.zeros((1, t_pad), jnp.float32).at[:, :t].set(beta.astype(jnp.float32))

    grid1 = (pl.cdiv(n, tm), pl.cdiv(v, tk))
    n_tiles = grid1[0]

    fp1 = footprint(tm, tk, w1_resident)
    vmem_limit1 = int(min(vmem_cap * 0.85, max(fp1 * 1.4 + (4 << 20), 32 << 20)))

    flops1 = 2 * n * v * e_pad + 2 * n * e_pad * t_pad
    bytes1 = (n * v * itemsize_x
              + (1 if w1_resident else n_tiles) * v_pad * e_pad * itemsize_w
              + e_pad * t_pad * itemsize_w
              + n * t_pad * 4
              + n_tiles * 8 * t_pad * 4)

    if w1_resident:
        w1_spec = pl.BlockSpec((v_pad, e_pad), lambda i, k: (0, 0))
    else:
        w1_spec = pl.BlockSpec((tk, e_pad), lambda i, k: (k, 0))

    kernel1 = functools.partial(_phase1_kernel, n_rows=n, v_cols=v, tk=tk,
                                w1_resident=w1_resident, mask_k=mask_k)

    a, stats = pl.pallas_call(
        kernel1,
        out_shape=(jax.ShapeDtypeStruct((n, t_pad), jnp.float32),
                   jax.ShapeDtypeStruct((n_tiles, 8, t_pad), jnp.float32)),
        grid_spec=pltpu.PrefetchScalarGridSpec(
            num_scalar_prefetch=0,
            grid=grid1,
            in_specs=[
                pl.BlockSpec((tm, tk), lambda i, k: (i, k)),         # x
                w1_spec,                                             # W1
                pl.BlockSpec((1, e_pad), lambda i, k: (0, 0)),       # b1
                pl.BlockSpec((e_pad, t_pad), lambda i, k: (0, 0)),   # W2
                pl.BlockSpec((1, t_pad), lambda i, k: (0, 0)),       # b2
            ],
            out_specs=[
                pl.BlockSpec((tm, t_pad), lambda i, k: (i, 0)),       # a
                pl.BlockSpec((1, 8, t_pad), lambda i, k: (i, 0, 0)),  # stats
            ],
            scratch_shapes=[pltpu.VMEM((tm, e_pad), jnp.float32)],
        ),
        compiler_params=pltpu.CompilerParams(
            dimension_semantics=("parallel", "arbitrary"),
            vmem_limit_bytes=vmem_limit1),
        cost_estimate=pl.CostEstimate(flops=int(flops1), transcendentals=0,
                                      bytes_accessed=int(bytes1)),
    )(x, w1p, b1p, w2p, b2p)

    # ----------------- Phase 2: BN (batch stats) + softplus ---------------
    tm2 = _pick_row_tile(n, 2048)
    grid2 = (pl.cdiv(n, tm2),)
    fp2 = 4 * tm2 * t_pad * 4 + 2 * n_tiles * 8 * t_pad * 4 + 8 * t_pad * 4
    vmem_limit2 = int(min(vmem_cap * 0.85, max(fp2 * 2, 16 << 20)))

    out = pl.pallas_call(
        functools.partial(_bn_softplus_kernel, n_rows=n, eps=1e-3),
        out_shape=jax.ShapeDtypeStruct((n, t_pad), jnp.float32),
        grid_spec=pltpu.PrefetchScalarGridSpec(
            num_scalar_prefetch=0,
            grid=grid2,
            in_specs=[
                pl.BlockSpec((n_tiles, 8, t_pad), lambda i: (0, 0, 0)),  # stats
                pl.BlockSpec((tm2, t_pad), lambda i: (i, 0)),            # a
                pl.BlockSpec((1, t_pad), lambda i: (0, 0)),              # gamma
                pl.BlockSpec((1, t_pad), lambda i: (0, 0)),              # beta
            ],
            out_specs=pl.BlockSpec((tm2, t_pad), lambda i: (i, 0)),
        ),
        compiler_params=pltpu.CompilerParams(
            dimension_semantics=("parallel",),
            vmem_limit_bytes=vmem_limit2),
        cost_estimate=pl.CostEstimate(
            flops=int(12 * n * t_pad), transcendentals=int(2 * n * t_pad),
            bytes_accessed=int(2 * n * t_pad * 4 + n_tiles * 8 * t_pad * 4)),
    )(stats, a, gp, bp)

    return out[:, :t]


if __name__ == "__main__":
    # Small shapes consistent with the module; deliberately NOT multiples of
    # the (8, 128) tile so the partial-tile masking paths are exercised.
    batch = 20
    vocab_size = 200
    embeddings_dim = 24
    hidden_dim = embeddings_dim          # "hidden_dim or embeddings_dim"
    num_topics = 10

    key = jax.random.PRNGKey(0)
    k_x, k_w1, k_b1, k_w2, k_b2, k_beta = jax.random.split(key, 6)

    x = jax.random.normal(k_x, (batch, vocab_size), jnp.float32)

    # Synthetic parameters (shapes from Encoder.__init__), pre-transposed to
    # (in_features, out_features) so the kernels do plain `x @ W`.
    w1 = jax.random.normal(k_w1, (vocab_size, embeddings_dim), jnp.float32) * 0.1
    b1 = jax.random.normal(k_b1, (1, embeddings_dim), jnp.float32) * 0.1
    w2 = jax.random.normal(k_w2, (hidden_dim, num_topics), jnp.float32) * 0.1
    b2 = jax.random.normal(k_b2, (1, num_topics), jnp.float32) * 0.1
    gamma = jnp.ones((1, num_topics), jnp.float32)   # BN weight frozen at 1
    beta = jax.random.normal(k_beta, (1, num_topics), jnp.float32) * 0.1

    # Reference with the same bf16-MXU / f32-accumulation math and
    # training-mode (biased) batch statistics.
    bf = jnp.bfloat16
    h = jnp.maximum(jnp.dot(x.astype(bf), w1.astype(bf),
                            preferred_element_type=jnp.float32) + b1, 0.0)
    a_ref = jnp.dot(h.astype(bf), w2.astype(bf),
                    preferred_element_type=jnp.float32) + b2
    mean = a_ref.mean(axis=0, keepdims=True)
    var = ((a_ref - mean) ** 2).mean(axis=0, keepdims=True)
    z = (a_ref - mean) / jnp.sqrt(var + 1e-3) * gamma + beta
    ref = jnp.maximum(jax.nn.softplus(z), 1e-5)

    # Run 1: small explicit tiles -> multi-tile grid on both axes, resident W1.
    out1 = jax.block_until_ready(
        encoder_forward(x, w1, b1, w2, b2, gamma, beta, tm=8, tk=128))
    # Run 2: auto tile selection, streamed-W1 code path.
    out2 = jax.block_until_ready(
        encoder_forward(x, w1, b1, w2, b2, gamma, beta, w1_resident=False))

    assert out1.shape == (batch, num_topics)
    assert out2.shape == (batch, num_topics)
    for o in (out1, out2):
        err = float(jnp.max(jnp.abs(o - ref)))
        assert jnp.allclose(o, ref, atol=3e-3, rtol=3e-3), err

    print("KERNEL_OK")
</pallas_src>

<mosaic_0001>
module attributes {stable_mosaic.version = 11 : i64} {
  func.func @_phase1_kernel(%arg0: i32, %arg1: i32, %arg2: memref<8x128xf32, #tpu.memory_space<vmem>>, %arg3: memref<256x128xbf16, #tpu.memory_space<vmem>>, %arg4: memref<1x128xf32, #tpu.memory_space<vmem>>, %arg5: memref<128x128xbf16, #tpu.memory_space<vmem>>, %arg6: memref<1x128xf32, #tpu.memory_space<vmem>>, %arg7: memref<8x128xf32, #tpu.memory_space<vmem>>, %arg8: memref<1x8x128xf32, #tpu.memory_space<vmem>>, %arg9: memref<8x128xf32, #tpu.memory_space<vmem>>) attributes {dimension_semantics = [#tpu.dimension_semantics<parallel>, #tpu.dimension_semantics<arbitrary>], iteration_bounds = array<i64: 3, 2>, scalar_prefetch = 0 : i64, scratch_operands = 1 : i64, tpu.core_type = #tpu.core_type<tc>, window_params = [{transform_indices = @transform_0, window_bounds = array<i64: 8, 128>}, {pipeline_mode = #tpu.pipeline_mode<synchronous>, transform_indices = @transform_1, window_bounds = array<i64: 256, 128>}, {pipeline_mode = #tpu.pipeline_mode<synchronous>, transform_indices = @transform_2, window_bounds = array<i64: 1, 128>}, {pipeline_mode = #tpu.pipeline_mode<synchronous>, transform_indices = @transform_3, window_bounds = array<i64: 128, 128>}, {pipeline_mode = #tpu.pipeline_mode<synchronous>, transform_indices = @transform_4, window_bounds = array<i64: 1, 128>}, {transform_indices = @transform_5, window_bounds = array<i64: 8, 128>}, {transform_indices = @transform_6, window_bounds = array<i64: 1, 8, 128>}]} {
    %c0_i32 = arith.constant 0 : i32
    %0 = arith.cmpi eq, %arg1, %c0_i32 : i32
    %1 = arith.extui %0 : i1 to i32
    %c0_i32_0 = arith.constant 0 : i32
    %2 = arith.cmpi ne, %1, %c0_i32_0 : i32
    scf.if %2 {
      %cst_10 = arith.constant 0.000000e+00 : f32
      %24 = vector.broadcast %cst_10 : f32 to vector<8x128xf32>
      %c0_11 = arith.constant 0 : index
      %c0_12 = arith.constant 0 : index
      %25 = vector.load %arg9[%c0_11, %c0_12] : memref<8x128xf32, #tpu.memory_space<vmem>>, vector<8x128xf32>
      tpu.vector_store %arg9[%c0_11, %c0_12], %24 {strides = array<i32>} : memref<8x128xf32, #tpu.memory_space<vmem>>, vector<8x128xf32>,
    } else {
    }
    %c0 = arith.constant 0 : index
    %c0_1 = arith.constant 0 : index
    %3 = vector.load %arg2[%c0, %c0_1] : memref<8x128xf32, #tpu.memory_space<vmem>>, vector<8x128xf32>
    %4 = arith.truncf %3 : vector<8x128xf32> to vector<8x128xbf16>
    %5 = tpu.iota {dimensions = array<i32: 1>} : vector<8x128xi32>
    %c128_i32 = arith.constant 128 : i32
    %6 = arith.muli %arg1, %c128_i32 : i32
    %7 = vector.broadcast %6 : i32 to vector<8x128xi32>
    %8 = arith.addi %5, %7 : vector<8x128xi32>
    %c200_i32 = arith.constant 200 : i32
    %9 = vector.broadcast %c200_i32 : i32 to vector<8x128xi32>
    %10 = arith.cmpi slt, %8, %9 : vector<8x128xi32>
    %cst = arith.constant 0.000000e+00 : bf16
    %11 = vector.broadcast %cst : bf16 to vector<8x128xbf16>
    %12 = arith.select %10, %4, %11 : vector<8x128xi1>, vector<8x128xbf16>
    %c128_i32_2 = arith.constant 128 : i32
    %13 = arith.muli %arg1, %c128_i32_2 : i32
    %14 = tpu.assume_multiple %13, 128 : i32
    %15 = arith.index_cast %14 : i32 to index
    %c0_3 = arith.constant 0 : index
    %16 = vector.load %arg3[%15, %c0_3] : memref<256x128xbf16, #tpu.memory_space<vmem>>, vector<128x128xbf16>
    %c0_4 = arith.constant 0 : index
    %c0_5 = arith.constant 0 : index
    %17 = vector.load %arg9[%c0_4, %c0_5] : memref<8x128xf32, #tpu.memory_space<vmem>>, vector<8x128xf32>
    %cst_6 = arith.constant dense<0.000000e+00> : vector<8x128xf32>
    %18 = tpu.matmul %12, %16, %cst_6 {dimension_numbers = #tpu.dot_dimension_numbers<[1], [0], [0], [1], [0, 0, 1, 1], [], []>} : vector<8x128xbf16>, vector<128x128xbf16>, vector<8x128xf32> -> vector<8x128xf32>
    %19 = arith.addf %17, %18 : vector<8x128xf32>
    %c0_7 = arith.constant 0 : index
    %c0_8 = arith.constant 0 : index
    %20 = vector.load %arg9[%c0_7, %c0_8] : memref<8x128xf32, #tpu.memory_space<vmem>>, vector<8x128xf32>
    tpu.vector_store %arg9[%c0_7, %c0_8], %19 {strides = array<i32>} : memref<8x128xf32, #tpu.memory_space<vmem>>, vector<8x128xf32>,
    %c1_i32 = arith.constant 1 : i32
    %21 = arith.cmpi eq, %arg1, %c1_i32 : i32
    %22 = arith.extui %21 : i1 to i32
    %c0_i32_9 = arith.constant 0 : i32
    %23 = arith.cmpi ne, %22, %c0_i32_9 : i32
    scf.if %23 {
      %c0_10 = arith.constant 0 : index
      %c0_11 = arith.constant 0 : index
      %24 = vector.load %arg9[%c0_10, %c0_11] : memref<8x128xf32, #tpu.memory_space<vmem>>, vector<8x128xf32>
      %c0_12 = arith.constant 0 : index
      %c0_13 = arith.constant 0 : index
      %25 = vector.load %arg4[%c0_12, %c0_13] : memref<1x128xf32, #tpu.memory_space<vmem>>, vector<1x128xf32>
      %26 = vector.broadcast %25 : vector<1x128xf32> to vector<8x128xf32>
      %27 = arith.addf %24, %26 : vector<8x128xf32>
      %cst_14 = arith.constant 0.000000e+00 : f32
      %28 = vector.broadcast %cst_14 : f32 to vector<8x128xf32>
      %29 = arith.maximumf %27, %28 : vector<8x128xf32>
      %30 = arith.truncf %29 : vector<8x128xf32> to vector<8x128xbf16>
      %c0_15 = arith.constant 0 : index
      %c0_16 = arith.constant 0 : index
      %31 = vector.load %arg5[%c0_15, %c0_16] : memref<128x128xbf16, #tpu.memory_space<vmem>>, vector<128x128xbf16>
      %cst_17 = arith.constant dense<0.000000e+00> : vector<8x128xf32>
      %32 = tpu.matmul %30, %31, %cst_17 {dimension_numbers = #tpu.dot_dimension_numbers<[1], [0], [0], [1], [0, 0, 1, 1], [], []>} : vector<8x128xbf16>, vector<128x128xbf16>, vector<8x128xf32> -> vector<8x128xf32>
      %c0_18 = arith.constant 0 : index
      %c0_19 = arith.constant 0 : index
      %33 = vector.load %arg6[%c0_18, %c0_19] : memref<1x128xf32, #tpu.memory_space<vmem>>, vector<1x128xf32>
      %34 = vector.broadcast %33 : vector<1x128xf32> to vector<8x128xf32>
      %35 = arith.addf %32, %34 : vector<8x128xf32>
      %c0_20 = arith.constant 0 : index
      %c0_21 = arith.constant 0 : index
      %36 = vector.load %arg7[%c0_20, %c0_21] : memref<8x128xf32, #tpu.memory_space<vmem>>, vector<8x128xf32>
      tpu.vector_store %arg7[%c0_20, %c0_21], %35 {strides = array<i32>} : memref<8x128xf32, #tpu.memory_space<vmem>>, vector<8x128xf32>,
      %37 = tpu.iota {dimensions = array<i32: 0>} : vector<8x128xi32>
      %c8_i32 = arith.constant 8 : i32
      %38 = arith.muli %arg0, %c8_i32 : i32
      %39 = vector.broadcast %38 : i32 to vector<8x128xi32>
      %40 = arith.addi %37, %39 : vector<8x128xi32>
      %c20_i32 = arith.constant 20 : i32
      %41 = vector.broadcast %c20_i32 : i32 to vector<8x128xi32>
      %42 = arith.cmpi slt, %40, %41 : vector<8x128xi32>
      %cst_22 = arith.constant 0.000000e+00 : f32
      %43 = vector.broadcast %cst_22 : f32 to vector<8x128xf32>
      %44 = arith.select %42, %35, %43 : vector<8x128xi1>, vector<8x128xf32>
      %cst_23 = arith.constant dense<0.000000e+00> : vector<128xf32>
      %45 = vector.multi_reduction <add>, %44, %cst_23 [0] : vector<8x128xf32> to vector<128xf32>
      %46 = vector.shape_cast %45 : vector<128xf32> to vector<1x128xf32>
      %47 = arith.mulf %44, %44 : vector<8x128xf32>
      %cst_24 = arith.constant dense<0.000000e+00> : vector<128xf32>
      %48 = vector.multi_reduction <add>, %47, %cst_24 [0] : vector<8x128xf32> to vector<128xf32>
      %49 = vector.shape_cast %48 : vector<128xf32> to vector<1x128xf32>
      %50 = tpu.iota {dimensions = array<i32: 0>} : vector<8x128xi32>
      %c0_i32_25 = arith.constant 0 : i32
      %51 = vector.broadcast %c0_i32_25 : i32 to vector<8x128xi32>
      %52 = arith.cmpi eq, %50, %51 : vector<8x128xi32>
      %c1_i32_26 = arith.constant 1 : i32
      %53 = vector.broadcast %c1_i32_26 : i32 to vector<8x128xi32>
      %54 = arith.cmpi eq, %50, %53 : vector<8x128xi32>
      %cst_27 = arith.constant 0.000000e+00 : f32
      %55 = vector.shape_cast %49 : vector<1x128xf32> to vector<1x128xf32>
      %56 = vector.broadcast %55 : vector<1x128xf32> to vector<8x128xf32>
      %57 = vector.broadcast %cst_27 : f32 to vector<8x128xf32>
      %58 = arith.select %54, %56, %57 : vector<8x128xi1>, vector<8x128xf32>
      %59 = vector.shape_cast %46 : vector<1x128xf32> to vector<1x128xf32>
      %60 = vector.broadcast %59 : vector<1x128xf32> to vector<8x128xf32>
      %61 = arith.select %52, %60, %58 : vector<8x128xi1>, vector<8x128xf32>
      %c0_28 = arith.constant 0 : index
      %c0_29 = arith.constant 0 : index
      %c0_30 = arith.constant 0 : index
      %62 = vector.load %arg8[%c0_28, %c0_29, %c0_30] : memref<1x8x128xf32, #tpu.memory_space<vmem>>, vector<1x8x128xf32>
      %63 = vector.shape_cast %62 : vector<1x8x128xf32> to vector<8x128xf32>
      %64 = vector.shape_cast %61 : vector<8x128xf32> to vector<1x8x128xf32>
      tpu.vector_store %arg8[%c0_28, %c0_29, %c0_30], %64 {strides = array<i32>} : memref<1x8x128xf32, #tpu.memory_space<vmem>>, vector<1x8x128xf32>,
    } else {
    }
    return
  }
  func.func @transform_0(%arg0: i32, %arg1: i32) -> (i32, i32) {
    %c0_i32 = arith.constant 0 : i32
    return %arg0, %arg1 : i32, i32
  }
  func.func @transform_1(%arg0: i32, %arg1: i32) -> (i32, i32) {
    %c0_i32 = arith.constant 0 : i32
    %c0_i32_0 = arith.constant 0 : i32
    %c0_i32_1 = arith.constant 0 : i32
    return %c0_i32, %c0_i32_0 : i32, i32
  }
  func.func @transform_2(%arg0: i32, %arg1: i32) -> (i32, i32) {
    %c0_i32 = arith.constant 0 : i32
    %c0_i32_0 = arith.constant 0 : i32
    %c0_i32_1 = arith.constant 0 : i32
    return %c0_i32, %c0_i32_0 : i32, i32
  }
  func.func @transform_3(%arg0: i32, %arg1: i32) -> (i32, i32) {
    %c0_i32 = arith.constant 0 : i32
    %c0_i32_0 = arith.constant 0 : i32
    %c0_i32_1 = arith.constant 0 : i32
    return %c0_i32, %c0_i32_0 : i32, i32
  }
  func.func @transform_4(%arg0: i32, %arg1: i32) -> (i32, i32) {
    %c0_i32 = arith.constant 0 : i32
    %c0_i32_0 = arith.constant 0 : i32
    %c0_i32_1 = arith.constant 0 : i32
    return %c0_i32, %c0_i32_0 : i32, i32
  }
  func.func @transform_5(%arg0: i32, %arg1: i32) -> (i32, i32) {
    %c0_i32 = arith.constant 0 : i32
    %c0_i32_0 = arith.constant 0 : i32
    return %arg0, %c0_i32 : i32, i32
  }
  func.func @transform_6(%arg0: i32, %arg1: i32) -> (i32, i32, i32) {
    %c0_i32 = arith.constant 0 : i32
    %c0_i32_0 = arith.constant 0 : i32
    %c0_i32_1 = arith.constant 0 : i32
    return %arg0, %c0_i32, %c0_i32_0 : i32, i32, i32
  }
}

</mosaic_0001>

<bundles_post_ra>
// kernel: tpu_custom_call.1
= control target key start
LH: loop header
LB: loop body
LE: loop exit
PB: predicated region body
PF: predicated region fallthrough
CT: control target
= control target key end

     0   :  { %s1575_s0 = inlined_call_operand.hbm [shape: f32[20,200], index: 0, kind: input, shape index: {}]   ;;  %s1576_s1 = inlined_call_operand.hbm [shape: bf16[256,128], index: 1, kind: input, shape index: {}]   ;;  %s1577_s2 = inlined_call_operand.vmem [shape: f32[1,128], index: 2, kind: input, shape index: {}]   ;;  %s1578_s3 = inlined_call_operand.hbm [shape: bf16[128,128], index: 3, kind: input, shape index: {}]   ;;  %s1579_s4 = inlined_call_operand.vmem [shape: f32[1,128], index: 4, kind: input, shape index: {}]   ;;  %s1580_s5 = inlined_call_operand.hbm [shape: f32[20,128], index: 5, kind: output, shape index: {0}]   ;;  %s1581_s6 = inlined_call_operand.hbm [shape: f32[3,8,128], index: 6, kind: output, shape index: {1}]  }
   0x1   :  { %1593 = sst [smem:[#allocation21_spill]] %s1576_s1 }
   0x2   :  { %1594 = sst [smem:[#allocation22_spill]] %s1577_s2 }
   0x3   :  { %1595 = sst [smem:[#allocation23_spill]] %s1578_s3 }
   0x4   :  { %1596 = sst [smem:[#allocation24_spill]] %s1579_s4 }
   0x5   :  { %1597 = sst [smem:[#allocation25_spill]] %s1580_s5 }
   0x6   :  { %1598 = sst [smem:[#allocation26_spill]] %s1581_s6 }
   0x7   :  { %12 = vsyncpa [#allocation4], 0 }
   0x8   :  { %14 = vsyncpa [#allocation4 + $0x1], 0 }
   0x9   :  { %15 = vsyncpa [#allocation7], 0 }
   0xa   :  { %16 = vsyncpa [#allocation5], 0 }
   0xb   :  { %18 = vsyncpa [#allocation5 + $0x1], 0 }
   0xc   :  { %19 = vsyncpa [#allocation11], 0 }
   0xd   :  { %21 = vsyncpa [#allocation11 + $0x1], 0  ;;  %s1306_s21 = smov 0   ;;  %s1308_s22 = smov 0  }
   0xe   :  { %s1310_s23 = smov 0   ;;  %s1312_s24 = smov 0  }
   0xf   :  { %s1314_s25 = smov 0   ;;  %s1316_s26 = smov 0  }
  0x10   :  { %s1318_s27 = smov 0   ;;  %s1320_s28 = smov 0  }
  0x11   :  { %s1322_s29 = smov 0   ;;  %s1324_s30 = smov 0  }
  0x12   :  { %s1326_s7 = smov 0  }
  0x13 LB: > { %1599 = sst [smem:[#allocation16_spill]] %s1217_s21  ;;  %s770_s8 = sadd.s32 4294967295, %s1257_s7   ;;  %s1257_s7 = sphi %s1326_s7, %s27_s7   ;;  %s1253_s30 = sphi %s1324_s30, %s1636_s30   ;;  %s1249_s29 = sphi %s1322_s29, %s1635_s29   ;;  %s1245_s28 = sphi %s1320_s28, %s1634_s28   ;;  %s1241_s27 = sphi %s1318_s27, %s1633_s27   ;;  %s1237_s26 = sphi %s1316_s26, %s1632_s26   ;;  %s1233_s25 = sphi %s1314_s25, %s1631_s25   ;;  %s1229_s24 = sphi %s1312_s24, %s1630_s24   ;;  %s1225_s23 = sphi %s1310_s23, %s1629_s23   ;;  %s1221_s22 = sphi %s1308_s22, %s1628_s22   ;;  %s1217_s21 = sphi %s1306_s21, %s1627_s21  }
  0x14   : > { %1600 = sst [smem:[#allocation17_spill]] %s1245_s28  ;;  %s771_s9 = sadd.s32 4294967294, %s1257_s7  }
  0x15   : > { %p61_p0 = scmp.ne.s32.totalorder %s1233_s25, %s1229_s24  ;;  %p1362_p1 = scmp.eq.s32.totalorder %s770_s8, 0 }
  0x16   : > { %p168_p2 = scmp.ne.s32.totalorder %s1225_s23, %s1221_s22  ;;  %p169_p3 = scmp.eq.s32.totalorder %s770_s8, 5 }
  0x17   : > { %s1601_s10 = scalar_select %p1362_p1, 1, 0 }
  0x18   : > { %p1370_p4 = por %p1362_p1, %p61_p0  ;;  %p174_p5 = scmp.ne.s32.totalorder %s1221_s22, %s1217_s21 }
  0x19   : > { %p1376_p6 = por %p169_p3, %p168_p2  ;;  %p175_p7 = scmp.eq.s32.totalorder %s771_s9, 5 }
  0x1a   : > { %p772_p8 = scmp.ge.s32.totalorder %s1257_s7, 1  ;;  %p208_p9 = scmp.lt.s32.totalorder %s1257_s7, 7 }
  0x1b   : > { %s1603_s12 = scalar_select %p1376_p6, 1, 0 }
  0x1c   : > { %p1382_p10 = por %p175_p7, %p174_p5  ;;  %p1386_p11 = pnand %p772_p8, %p208_p9 }
  0x1d   : > { %1604 = sst [smem:[#allocation18_spill]] %s1603_s12  ;;  %s1259_s15 = smov [#allocation6]  }
  0x1e   : > { %s1605_s13 = scalar_select %p1382_p10, 1, 0 }
  0x1f   : > { %s220_s16 = sshll.u32 %s1259_s15, 4  ;;  %p886_p12 = pneg %p1386_p11  ;;  %s221_s16 = int_to_ptr.vmem [resolvable:$true] %s220_s16 }
  0x20   : > { %1606 = sst [smem:[#allocation19_spill]] %s1605_s13  ;;  %s1260_s18 = smov [#allocation8]  }
  0x21   : > { %p1394_p13 = pnand %p886_p12, %p1362_p1  ;;  %s236_s19 = sshll.u32 %s1260_s18, 4  ;;  %s237_s19 = int_to_ptr.vmem [resolvable:$true] %s236_s19 }
  0x22   : > { %s1034_s20 = scalar_lea.vmem %s221_s16, 2048  ;;  %p1042_p7 = scmp.lt.s32.totalorder %s221_s16, %s221_s16 }
  0x23   : > { %p1025_p0 = pneg %p1394_p13  ;;  %p1035_p2 = scmp.ne.s32.totalorder %s221_s16, %s1034_s20 }
  0x24   : > { %p1043_p8 = scmp.lt.s32.totalorder %s1034_s20, %s1034_s20 }
  0x25   : > { %p1037_p3 = pnand %p1035_p2, %p1025_p0 }
  0x26   : > { %p1044_p9 = por %p1043_p8, %p1042_p7 }
  0x27   : > { %p1038_p5 = pneg %p1037_p3 }
  0x29   : > { %p1045_p12 = pnand %p1044_p9, %p1038_p5 }
  0x2b   : > { %1048 = shalt.err (!%p1045_p12)
}
  0x2c   : > { %s1261_s24 = smov 64   ;;  %s1262_s8 = smov 4  }
  0x2d   : > { %s1609_s1 = sld [smem:[#allocation21_spill]]  ;;  %s1060_s18 = scalar_lea.vmem %s237_s19, 1024 }
  0x2e   : > { %p1061_p10 = scmp.ne.s32.totalorder %s237_s19, %s1060_s18  ;;  %p1068_p6 = scmp.lt.s32.totalorder %s237_s19, %s237_s19 }
  0x2f   : > { %p1069_p1 = scmp.lt.s32.totalorder %s1060_s18, %s1060_s18 }
  0x30   : > { %p1063_p2 = pnand %p1061_p10, %p1025_p0 }
  0x31   : > { %p1070_p7 = por %p1069_p1, %p1068_p6 }
  0x32   : > { %p1064_p3 = pneg %p1063_p2 }
  0x33   : > { %889 = dma.hbm_to_vmem [thread:$0]  (!%p1394_p13), %s1609_s1, 2048, %s221_s16, [#allocation7], %s1261_s24, %s1261_s24, %s1262_s8  }
  0x34   : > { %p1071_p5 = pnand %p1070_p7, %p1064_p3 }
  0x36   : > { %1074 = shalt.err (!%p1071_p5)
}
  0x37   : > { %s1610_s3 = sld [smem:[#allocation23_spill]]  ;;  %s36_s16 = sadd.s32 1, %s1249_s29 }
  0x38   : > { %p37_p1 = scmp.ge.s32.totalorder %s36_s16, 2  ;;  %s39_s17 = sadd.s32 1, %s1253_s30 }
  0x39   : > { %p55_p6 = scmp.ne.s32.totalorder %s1237_s26, %s1233_s25  ;;  %s48_s13 = sadd.s32 1, %s1237_s26 }
  0x3a   : > { %s1638_s16 = smov (%p37_p1, %s36_s16), 0  ;;  %s1640_s17 = smov (!%p37_p1, %s39_s17), %s1253_s30 }
  0x3b   : > { %1611 = sst [smem:[#allocation20_spill]] %s1638_s16  ;;  %p56_p10 = scmp.eq.s32.totalorder %s1257_s7, 0 }
  0x3c   : > { %p41_p0 = scmp.ge.s32.totalorder %s1640_s17, 3  ;;  %s44_s9 = ssub.s32 %s1249_s29, %s1638_s16 }
  0x3d   : > { %892 = dma.hbm_to_vmem [thread:$0]  (!%p1394_p13), %s1610_s3, 1024, %s237_s19, [#allocation7], %s1261_s24, %s1261_s24, %s1262_s8  }
  0x3e   : > { %p1427_p8 = por %p56_p10, %p55_p6  ;;  %s158_s19 = sadd.s32 1, %s1225_s23 }
  0x3f   : > { %s1642_s17 = smov (%p41_p0, %s1640_s17), 0  ;;  %p906_p13 = scmp.lt.s32.totalorder %s1257_s7, 6 }
  0x40   : > { %s253_s24 = sand.u32 1, %s1237_s26   ;;  %s43_s8 = ssub.s32 %s1253_s30, %s1642_s17 }
  0x41   : > { %s777_s18 = sshll.u32 %s1253_s30, 1  ;;  %s45_s20 = sor.u32 %s44_s9, %s43_s8 }
  0x42   : > { %p156_p9 = scmp.eq.s32.totalorder %s43_s8, 0  ;;  %p46_p12 = scmp.eq.s32.totalorder %s45_s20, 0 }
  0x43   : > { %s776_s1 = sshll.u32 %s253_s24, 3  ;;  %s262_s21 = sadd.s32 %s1249_s29, %s777_s18 }
  0x44   : > { %s1440_s3 = scalar_select %p156_p9, %s1225_s23, %s158_s19  }
  0x45   : > { %s1443_s16 = scalar_select %p46_p12, %s1237_s26, %s48_s13  }
  0x46   : > { %s778_s6 = sshll.u32 %s262_s21, 7  ;;  %s257_s5 = scalar_lea.vmem [#allocation3], %s776_s1 }
  0x47   : > { %s266_s12 = sshll.u32 %s257_s5, 4  ;;  %s264_s28 = scalar_lea.hbm %s1575_s0, %s778_s6  ;;  %s267_s12 = int_to_ptr.vmem [resolvable:$true] %s266_s12 }
  0x48   : > { %p1453_p2 = pnand %p906_p13, %p1427_p8  ;;  %s254_s19 = scalar_lea.sflag [#allocation4], %s253_s24 }
  0x49   : > { %s1088_s13 = scalar_lea.vmem %s267_s12, 128  ;;  %s1263_s1 = smov [#allocation3]  }
  0x4a   : > { %p1077_p3 = pneg %p1453_p2  ;;  %p1089_p7 = scmp.ne.s32.totalorder %s267_s12, %s1088_s13 }
  0x4b   : > { %s1093_s5 = sshll.u32 %s1263_s1, 4  ;;  %s1094_s5 = int_to_ptr.vmem [resolvable:$false] %s1093_s5 }
  0x4c   : > { %p1091_p5 = pnand %p1089_p7, %p1077_p3  ;;  %s1095_s2 = scalar_lea.vmem %s1094_s5, 256 }
  0x4d   : > { %p1096_p6 = scmp.lt.s32.totalorder %s267_s12, %s1094_s5  ;;  %p1097_p10 = scmp.lt.s32.totalorder %s1095_s2, %s1088_s13 }
  0x4e   : > { %p1092_p1 = pneg %p1091_p5 }
  0x4f   : > { %p1098_p0 = por %p1097_p10, %p1096_p6 }
  0x51   : > { %p1099_p9 = pnand %p1098_p0, %p1092_p1 }
  0x53   : > { %1102 = shalt.err (!%p1099_p9)
}
  0x54   : > { %896 = dma.hbm_to_vmem [thread:$0]  (!%p1453_p2), %s264_s28, 128, %s267_s12, %s254_s19  }
  0x55   : > { %275 = sbr.rel (%p1386_p11) target bundleno = 635 (0x27b), region = 40  ;;  %s277_s4 = sand.u32 (!%p1386_p11), 1, %s1233_s25  }
  0x56   : > { %s1464_s6 = sshll.u32 (!%p1386_p11), %s277_s4, 3  ;;  %s278_s21 = scalar_lea.sflag (!%p1386_p11), [#allocation4], %s277_s4 }
  0x57   : > { %s281_s15 = scalar_lea.vmem (!%p1386_p11), [#allocation3], %s1464_s6 }
  0x5a   : > { %1200 = dma.done.wait (%p1370_p4), %s278_s21, 128  }
  0x5b   : > { %1202 = vsyncadd (%p1370_p4), %s278_s21, 4294967168  ;;  %p1614_p8 = scmp.ne.s32.totalorder %s1601_s10, 0 }
  0x5d   : > { %1204 = dma.done.wait (%p1614_p8), [#allocation7], 3072  }
  0x5e   : > { %1206 = vsyncadd (%p1614_p8), [#allocation7], 4294964224  ;;  %s1476_s28 = sand.u32 1, %s1221_s22   ;;  %p785_p11 = scmp.ne.s32.totalorder %s1241_s27, 0 }
  0x5f   : > { %s783_s12 = sshll.u32 %s1476_s28, 3 }
  0x60   : > { %s1479_s14 = scalar_lea.vmem [#allocation9], %s783_s12  ;;  %s1481_s24 = scalar_lea.vmem [#allocation10], %s783_s12 }
  0x61   : > { %327 = sbr.rel (%p785_p11) target bundleno = 104 (0x68), region = 56 }
  0x66   : > { %v1264_v0 = vmov 0.0  }
  0x67   : > { %328 = vst [vmem:[#allocation2] sm:$0xff] %v1264_v0 }
  0x68 PF: > { %s786_s11 = sshll.u32 %s1241_s27, 7  ;;  %v1265_v1 = vmov 0.0   ;;  %vm1266_vm0 = vmmov 0   ;;  %v331_v6 = vlaneseq  ;;  %v329_v13 = vld [vmem:[%s281_s15] sm:$0xff]  ;;  %p796_p4 = scmp.ne.s32.totalorder %s1241_s27, 1 }
  0x69   : > { %832 = vmatprep.subr.bf16.mxu0 %v1265_v1  ;;  %s339_s10 = sshra.s32 %s786_s11, 3  ;;  %848 = vmatprep.mubr.msk.bf16.mxu0 %vm1266_vm0, %v1265_v1  ;;  %v334_v9 = vstv %s786_s11  ;;  %v330_v15 = vpack.c.bf16 %v329_v13, %v329_v13  ;;  %s1615_s27 = sld [smem:[#allocation17_spill]] (!%p796_p4) }
  0x6a   : > { %s787_s8 = sshll.u32 %s339_s10, 2  ;;  %v332_v8 = vand.u32 127, %v331_v6  ;;  %s1616_s19 = sld [smem:[#allocation22_spill]] (!%p796_p4) }
  0x6b   : > { %s342_s18 = scalar_lea.vmem [#allocation6], %s787_s8  ;;  %s1617_s2 = sld [smem:[#allocation24_spill]] (!%p796_p4) }
  0x6c   : > { %v1007_v2 = vld [vmem:[%s342_s18 + $0x38] sm:$0xff]   ;;  %v1008_v3 = vld [vmem:[%s342_s18 + $0x30] sm:$0xff]   ;;  %v1009_v4 = vld [vmem:[%s342_s18 + $0x28] sm:$0xff]   ;;  %v335_v11 = vadd.s32 %v334_v9, %v332_v8 }
  0x6d   : > { %833 = vmatpush3.bf16.msra.mxu0 %v1007_v2  ;;  %v1010_v5 = vld [vmem:[%s342_s18 + $0x20] sm:$0xff]   ;;  %v1011_v7 = vld [vmem:[%s342_s18 + $0x18] sm:$0xff]   ;;  %v1012_v10 = vld [vmem:[%s342_s18 + $0x10] sm:$0xff]  }
  0x6e   : > { %834 = vmatprep.subr.bf16.mxu0 %v1265_v1  ;;  %v1013_v12 = vld [vmem:[%s342_s18 + $0x8] sm:$0xff]   ;;  %vm336_vm1 = vcmp.lt.s32.totalorder %v335_v11, 200  ;;  %v1014_v14 = vld [vmem:[%s342_s18] sm:$0xff]  }
  0x6f   : > { %vm337_vm2 = vmpackc.low %vm336_vm1, %vm336_vm1  ;;  %v359_v17 = vld [vmem:[#allocation2] sm:$0xff]  ;;  %s807_s13 = sshll.u32 (!%p796_p4), %s1615_s27, 3 }
  0x70   : > { %v338_v16 = vsel %vm337_vm2, %v330_v15, 0 }
  0x71   : > { %835 = vmatpush3.bf16.msra.mxu0 %v1008_v3 }
  0x72   : > { %836 = vmatprep.subr.bf16.mxu0 %v1265_v1 }
  0x75   : > { %837 = vmatpush3.bf16.msra.mxu0 %v1009_v4 }
  0x76   : > { %838 = vmatprep.subr.bf16.mxu0 %v1265_v1 }
  0x79   : > { %839 = vmatpush3.bf16.msra.mxu0 %v1010_v5 }
  0x7a   : > { %840 = vmatprep.subr.bf16.mxu0 %v1265_v1 }
  0x7d   : > { %841 = vmatpush3.bf16.msra.mxu0 %v1011_v7 }
  0x7e   : > { %842 = vmatprep.subr.bf16.mxu0 %v1265_v1 }
  0x81   : > { %843 = vmatpush3.bf16.msra.mxu0 %v1012_v10 }
  0x82   : > { %844 = vmatprep.subr.bf16.mxu0 %v1265_v1 }
  0x85   : > { %845 = vmatpush3.bf16.msra.mxu0 %v1013_v12 }
  0x86   : > { %846 = vmatprep.subr.bf16.mxu0 %v1265_v1 }
  0x89   : > { %847 = vmatpush3.bf16.msra.mxu0 %v1014_v14 }
  0x8c   : > { %849 = vmatmul.mubr.bf16.vlgmr.msra.gmra.mxu0 %v338_v16 }
 0x14c   : > { %v442_v18 = vpop.f32.mrf.mxu0 }
 0x14d   : > { %v448_v19 = vadd.f32 %v442_v18, %v359_v17 }
 0x14e   : > { %v850_v20 = vpop.f32.mrf.mxu0  ;;  %453 = sbr.rel (%p796_p4) target bundleno = 585 (0x249), region = 60 }
 0x14f   : > { %449 = vst [vmem:[#allocation2] sm:$0xff] %v448_v19 }
 0x150   : > { %v445_v21 = vpop.f32.mrf.mxu0 }
 0x152   : > { %v851_v22 = vpop.f32.mrf.mxu0 }
 0x153   : > { %v1015_v23 = vld [vmem:[#allocation8 + $0x38] sm:$0xff]   ;;  %v1267_v24 = vmov 0.0   ;;  %v1016_v25 = vld [vmem:[#allocation8 + $0x30] sm:$0xff]   ;;  %vm1268_vm3 = vmmov 0   ;;  %v1017_v26 = vld [vmem:[#allocation8 + $0x28] sm:$0xff]   ;;  %v578_v37 = vshrl.u32 %v331_v6, 7  ;;  %v580_v38 = vstv %s807_s13 }
 0x154   : > { %852 = vmatprep.subr.bf16.mxu0 %v1267_v24  ;;  %868 = vmatprep.mubr.msk.bf16.mxu0 %vm1268_vm3, %v1267_v24  ;;  %v1018_v27 = vld [vmem:[#allocation8 + $0x20] sm:$0xff]   ;;  %v1019_v28 = vld [vmem:[#allocation8 + $0x18] sm:$0xff]   ;;  %v1020_v29 = vld [vmem:[#allocation8 + $0x10] sm:$0xff]  }
 0x155   : > { %853 = vmatpush3.bf16.msra.mxu0 %v1015_v23  ;;  %v797_v31 = vld [vmem:[%s1616_s19] ss:$0 sm:$0xff]  ;;  %v1022_v35 = vld [vmem:[#allocation8] sm:$0xff]   ;;  %v581_v39 = vadd.s32 %v580_v38, %v578_v37  ;;  %vm598_vm5 = vcmp.eq.s32.totalorder %v578_v37, 1  ;;  %vm597_vm6 = vcmp.eq.s32.totalorder %v578_v37, 0 }
 0x156   : > { %854 = vmatprep.subr.bf16.mxu0 %v1267_v24  ;;  %v454_v30 = vld [vmem:[#allocation2] sm:$0xff] }
 0x157   : > { %v462_v32 = vadd.f32 %v797_v31, %v454_v30  ;;  %v1021_v33 = vld [vmem:[#allocation8 + $0x8] sm:$0xff]   ;;  %vm582_vm4 = vcmp.lt.s32.totalorder %v581_v39, 20 }
 0x158   : > { %v798_v40 = vld [vmem:[%s1617_s2] ss:$0 sm:$0xff] }
 0x159   : > { %855 = vmatpush3.bf16.msra.mxu0 %v1016_v25  ;;  %v463_v34 = vmax.f32 %v462_v32, 0.0 }
 0x15a   : > { %856 = vmatprep.subr.bf16.mxu0 %v1267_v24 }
 0x15b   : > { %v464_v36 = vpack.c.bf16 %v463_v34, %v463_v34 }
 0x15d   : > { %857 = vmatpush3.bf16.msra.mxu0 %v1017_v26 }
 0x15e   : > { %858 = vmatprep.subr.bf16.mxu0 %v1267_v24 }
 0x161   : > { %859 = vmatpush3.bf16.msra.mxu0 %v1018_v27 }
 0x162   : > { %860 = vmatprep.subr.bf16.mxu0 %v1267_v24 }
 0x165   : > { %861 = vmatpush3.bf16.msra.mxu0 %v1019_v28 }
 0x166   : > { %862 = vmatprep.subr.bf16.mxu0 %v1267_v24 }
 0x169   : > { %863 = vmatpush3.bf16.msra.mxu0 %v1020_v29 }
 0x16a   : > { %864 = vmatprep.subr.bf16.mxu0 %v1267_v24 }
 0x16d   : > { %865 = vmatpush3.bf16.msra.mxu0 %v1021_v33 }
 0x16e   : > { %866 = vmatprep.subr.bf16.mxu0 %v1267_v24 }
 0x171   : > { %867 = vmatpush3.bf16.msra.mxu0 %v1022_v35 }
 0x174   : > { %869 = vmatmul.mubr.bf16.vlgmr.msra.gmra.mxu0 %v464_v36 }
 0x234   : > { %v570_v41 = vpop.f32.mrf.mxu0 }
 0x235   : > { %v571_v42 = vadd.f32 %v798_v40, %v570_v41 }
 0x236   : > { %v870_v43 = vpop.f32.mrf.mxu0 }
 0x237   : > { %576 = vst [vmem:[%s1479_s14] sm:$0xff] %v571_v42  ;;  %v583_v44 = vsel %vm582_vm4, %v571_v42, 0.0 }
 0x238   : > { %v584_v45 = vrot.slane %v583_v44, 4  ;;  %v590_v46 = vmul.f32 %v583_v44, %v583_v44  ;;  %v573_v47 = vpop.f32.mrf.mxu0 }
 0x23a   : > { %v585_v48 = vadd.f32 %v584_v45, %v583_v44  ;;  %v591_v49 = vrot.slane %v590_v46, 4  ;;  %v871_v50 = vpop.f32.mrf.mxu0 }
 0x23c   : > { %v586_v51 = vrot.slane %v585_v48, 2  ;;  %v592_v52 = vadd.f32 %v591_v49, %v590_v46 }
 0x23e   : > { %v587_v53 = vadd.f32 %v586_v51, %v585_v48  ;;  %v593_v54 = vrot.slane %v592_v52, 2 }
 0x240   : > { %v594_v55 = vadd.f32 %v593_v54, %v592_v52  ;;  %v588_v56 = vrot.slane %v587_v53, 1 }
 0x242   : > { %v595_v57 = vrot.slane %v594_v55, 1  ;;  %v589_v59 = vadd.f32 %v588_v56, %v587_v53 }
 0x244   : > { %v596_v58 = vadd.f32 %v595_v57, %v594_v55 }
 0x246   : > { %v599_v60 = vsel %vm598_vm5, %v596_v58, 0.0 }
 0x247   : > { %v600_v61 = vsel %vm597_vm6, %v589_v59, %v599_v60 }
 0x248   : > { %601 = vst [vmem:[%s1481_s24] sm:$0xff] %v600_v61 }
 0x249 PF: > { %s1618_s4 = sld [smem:[#allocation17_spill]]  ;;  %s621_s8 = sshll.u32 %s1479_s14, 4  ;;  %s622_s8 = int_to_ptr.vmem [resolvable:$true] %s621_s8 }
 0x24a   : > { %s1619_s6 = sld [smem:[#allocation18_spill]]  ;;  %s603_s18 = scalar_lea.sflag [#allocation5], %s1476_s28 }
 0x24b   : > { %s1620_s11 = sld [smem:[#allocation25_spill]]  ;;  %s1103_s27 = scalar_lea.vmem %s622_s8, 128 }
 0x24c   : > { %p1104_p13 = scmp.ne.s32.totalorder %s622_s8, %s1103_s27  ;;  %s1269_s20 = smov [#allocation9]  }
 0x24d   : > { %s1107_s9 = sshll.u32 %s1269_s20, 4  ;;  %s1108_s9 = int_to_ptr.vmem [resolvable:$false] %s1107_s9 }
 0x24e   : > { %s1109_s19 = scalar_lea.vmem %s1108_s9, 256  ;;  %p1110_p7 = scmp.lt.s32.totalorder %s622_s8, %s1108_s9 }
 0x24f   : > { %s810_s21 = sshll.u32 %s1618_s4, 7  ;;  %p1111_p5 = scmp.lt.s32.totalorder %s1109_s19, %s1103_s27 }
 0x250   : > { %p1621_p12 = scmp.ne.s32.totalorder %s1619_s6, 0 }
 0x251   : > { %s619_s10 = scalar_lea.hbm %s1620_s11, %s810_s21  ;;  %p1112_p1 = por %p1111_p5, %p1110_p7 }
 0x252   : > { %p1105_p2 = pnand %p1104_p13, %p1621_p12 }
 0x254   : > { %p1106_p3 = pneg %p1105_p2 }
 0x256   : > { %p1113_p6 = pnand %p1112_p1, %p1106_p3 }
 0x258   : > { %1116 = shalt.err (!%p1113_p6)
}
 0x259   : > { %s1117_s13 = scalar_lea.hbm %s619_s10, 128  ;;  %s1121_s5 = scalar_lea.hbm %s1620_s11, 384 }
 0x25a   : > { %p1118_p10 = scmp.ne.s32.totalorder %s619_s10, %s1117_s13  ;;  %p1122_p8 = scmp.lt.s32.totalorder %s619_s10, %s1620_s11 }
 0x25b   : > { %p1123_p11 = scmp.lt.s32.totalorder %s1121_s5, %s1117_s13 }
 0x25c   : > { %p1119_p0 = pnand %p1118_p10, %p1621_p12 }
 0x25d   : > { %p1124_p4 = por %p1123_p11, %p1122_p8 }
 0x25e   : > { %p1120_p9 = pneg %p1119_p0 }
 0x260   : > { %p1125_p13 = pnand %p1124_p4, %p1120_p9 }
 0x262   : > { %1128 = shalt.err (!%p1125_p13)
}
 0x263   : > { %882 = dma.vmem_to_hbm [thread:$0]  (%p1621_p12), %s622_s8, 128, %s619_s10, %s603_s18  }
 0x264   : > { %s1622_s20 = sld [smem:[#allocation26_spill]]  ;;  %s634_s19 = sshll.u32 %s1481_s24, 4  ;;  %s635_s19 = int_to_ptr.vmem [resolvable:$true] %s634_s19 }
 0x265   : > { %s608_s14 = scalar_lea.sflag [#allocation11], %s1476_s28  ;;  %s1129_s1 = scalar_lea.vmem %s635_s19, 128 }
 0x266   : > { %p1130_p2 = scmp.ne.s32.totalorder %s635_s19, %s1129_s1  ;;  %s1270_s13 = smov [#allocation10]  }
 0x267   : > { %s1133_s5 = sshll.u32 %s1270_s13, 4  ;;  %s1134_s5 = int_to_ptr.vmem [resolvable:$false] %s1133_s5 }
 0x268   : > { %p1131_p3 = pnand %p1130_p2, %p1621_p12  ;;  %s1135_s2 = scalar_lea.vmem %s1134_s5, 256 }
 0x269   : > { %p1136_p5 = scmp.lt.s32.totalorder %s635_s19, %s1134_s5  ;;  %p1137_p1 = scmp.lt.s32.totalorder %s1135_s2, %s1129_s1 }
 0x26a   : > { %s632_s9 = scalar_lea.hbm %s1622_s20, %s810_s21  ;;  %p1132_p7 = pneg %p1131_p3 }
 0x26b   : > { %p1138_p6 = por %p1137_p1, %p1136_p5 }
 0x26d   : > { %p1139_p10 = pnand %p1138_p6, %p1132_p7 }
 0x26f   : > { %1142 = shalt.err (!%p1139_p10)
}
 0x270   : > { %s1143_s4 = scalar_lea.hbm %s632_s9, 128  ;;  %s1147_s21 = scalar_lea.hbm %s1622_s20, 384 }
 0x271   : > { %p1144_p0 = scmp.ne.s32.totalorder %s632_s9, %s1143_s4  ;;  %p1148_p11 = scmp.lt.s32.totalorder %s632_s9, %s1622_s20 }
 0x272   : > { %p1149_p4 = scmp.lt.s32.totalorder %s1147_s21, %s1143_s4 }
 0x273   : > { %p1145_p9 = pnand %p1144_p0, %p1621_p12 }
 0x274   : > { %p1150_p13 = por %p1149_p4, %p1148_p11 }
 0x275   : > { %p1146_p8 = pneg %p1145_p9 }
 0x277   : > { %p1151_p2 = pnand %p1150_p13, %p1146_p8 }
 0x279   : > { %1154 = shalt.err (!%p1151_p2)
}
 0x27a   : > { %883 = dma.vmem_to_hbm [thread:$0]  (%p1621_p12), %s635_s19, 128, %s632_s9, %s608_s14  }
 0x27b PF: > { %s1623_s18 = sld [smem:[#allocation16_spill]]  ;;  %p909_p3 = scmp.ge.s32.totalorder %s1257_s7, 2 }
 0x27c   : > { %s1624_s15 = sld [smem:[#allocation19_spill]] }
 0x281   : > { %s646_s12 = sand.u32 1, %s1623_s18  }
 0x282   : > { %p1625_p7 = scmp.ne.s32.totalorder %s1624_s15, 0  ;;  %s647_s27 = scalar_lea.sflag [#allocation5], %s646_s12 }
 0x284   : > { %p898_p5 = pnand %p909_p3, %p1625_p7 }
 0x286   : > { %p899_p1 = pneg %p898_p5 }
 0x288   : > { %1208 = dma.done.wait (%p899_p1), %s647_s27, 128  }
 0x289   : > { %1210 = vsyncadd (%p899_p1), %s647_s27, 4294967168  ;;  %s656_s1 = scalar_lea.sflag [#allocation11], %s646_s12 }
 0x28a   : > { %1212 = dma.done.wait (%p899_p1), %s656_s1, 128  }
 0x28b   : > { %1214 = vsyncadd (%p899_p1), %s656_s1, 4294967168  ;;  %s27_s7 = sadd.s32 1, %s1257_s7   ;;  %s1626_s6 = sld [smem:[#allocation20_spill]] }
 0x28c   : > { %p24_p6 = scmp.ge.s32.totalorder %s27_s7, 8   ;;  %s1627_s21 = smov %s1221_s22 }
 0x28d   : > { %s1628_s22 = smov %s1225_s23  ;;  %s1629_s23 = smov %s1440_s3 }
 0x28e   : > { %s1630_s24 = smov %s1233_s25  ;;  %s1631_s25 = smov %s1237_s26 }
 0x28f   : > { %s1632_s26 = smov %s1443_s16  ;;  %s1633_s27 = smov %s1249_s29 }
 0x290   : > { %s1634_s28 = smov %s1253_s30  ;;  %s1636_s30 = smov %s1642_s17 }
 0x291   : > { %s1635_s29 = smov %s1626_s6  ;;  %26 = sbr.rel (!%p24_p6) target bundleno = 19 (0x13), region = 119 }
 0x296   :  { %661 = vsyncpa [#allocation4], 1 }
 0x297   :  { %663 = vsyncpa [#allocation4 + $0x1], 1 }
 0x298   :  { %664 = vsyncpa [#allocation7], 1 }
 0x299   :  { %665 = vsyncpa [#allocation5], 1 }
 0x29a   :  { %667 = vsyncpa [#allocation5 + $0x1], 1 }
 0x29b   :  { %668 = vsyncpa [#allocation11], 1 }
 0x29c   :  { %670 = vsyncpa [#allocation11 + $0x1], 1 }

</bundles_post_ra>
